<compile_context>
chip_gen: v6e
topology: v6e:2x2x1
jax: 0.10.0
libtpu: 0.0.40
codegen_flags: <defaults>
</compile_context>

<pallas_src>
import functools

import jax
import jax.numpy as jnp
from jax.experimental import pallas as pl
from jax.experimental.pallas import tpu as pltpu


def _round_up(x, m):
    return (x + m - 1) // m * m


def _infonce_kernel(q1_ref, q2_ref, k1_ref, k2_ref, out_ref,
                    m1_ref, l1_ref, m2_ref, l2_ref,
                    *, tile, batch, n_blocks, has_pad):
    qi = pl.program_id(0)
    kj = pl.program_id(1)
    nk = pl.num_programs(1)
    neg_inf = jnp.float32(-jnp.inf)

    # ---- per-query-block init of the online-logsumexp accumulators --------
    @pl.when(kj == 0)
    def _init():
        m1_ref[...] = jnp.full_like(m1_ref, neg_inf)
        m2_ref[...] = jnp.full_like(m2_ref, neg_inf)
        l1_ref[...] = jnp.zeros_like(l1_ref)
        l2_ref[...] = jnp.zeros_like(l2_ref)

    def nt(a, b):  # a @ b.T on the MXU with f32 accumulation
        return jax.lax.dot_general(a, b, (((1,), (1,)), ((), ())),
                                   preferred_element_type=jnp.float32)

    def mask_diag(s):  # only executed on qi == kj tiles (lax.cond)
        r = jax.lax.broadcasted_iota(jnp.int32, (tile, tile), 0)
        c = jax.lax.broadcasted_iota(jnp.int32, (tile, tile), 1)
        return jnp.where(r == c, neg_inf, s)

    valid_cols = batch - (n_blocks - 1) * tile  # valid columns in last key tile

    def mask_pad(sa, sb):  # only executed on the last key tile (lax.cond)
        c = jax.lax.broadcasted_iota(jnp.int32, (1, tile), 1)
        ok = c < valid_cols
        return jnp.where(ok, sa, neg_inf), jnp.where(ok, sb, neg_inf)

    def lse_update(m_ref, l_ref, sa, sb):
        t = jnp.maximum(jnp.max(sa, axis=-1, keepdims=True),
                        jnp.max(sb, axis=-1, keepdims=True))
        m_new = jnp.maximum(m_ref[...], t)
        l_ref[...] = (jnp.exp(m_ref[...] - m_new) * l_ref[...]
                      + jnp.sum(jnp.exp(sa - m_new), axis=-1, keepdims=True)
                      + jnp.sum(jnp.exp(sb - m_new), axis=-1, keepdims=True))
        m_ref[...] = m_new

    k1 = k1_ref[...]
    k2 = k2_ref[...]

    # ---- rows 0..B-1: logits [s12 | s11] (consumed before the second half
    #      so at most ~2 (tile, tile) f32 tiles stay live) -------------------
    q1 = q1_ref[...]
    s12 = nt(q1, k2)
    s11 = nt(q1, k1)
    s11 = jax.lax.cond(qi == kj, mask_diag, lambda s: s, s11)
    if has_pad:
        s12, s11 = jax.lax.cond(kj == nk - 1, mask_pad,
                                lambda a, b: (a, b), s12, s11)
    lse_update(m1_ref, l1_ref, s12, s11)

    # ---- rows B..2B-1: logits [s22 | s12.T] == [s22 | s21] -----------------
    q2 = q2_ref[...]
    s22 = nt(q2, k2)
    s21 = nt(q2, k1)
    s22 = jax.lax.cond(qi == kj, mask_diag, lambda s: s, s22)
    if has_pad:
        s22, s21 = jax.lax.cond(kj == nk - 1, mask_pad,
                                lambda a, b: (a, b), s22, s21)
    lse_update(m2_ref, l2_ref, s22, s21)

    # ---- finalize: per-row lse1 + lse2 for this query block ----------------
    @pl.when(kj == nk - 1)
    def _finalize():
        out_ref[...] = (m1_ref[...] + jnp.log(l1_ref[...])
                        + m2_ref[...] + jnp.log(l2_ref[...]))


def infonce_loss(aug_hidden_view1, aug_hidden_view2, *, temperature,
                 similarity_type, mask=None, compute_dtype=jnp.bfloat16,
                 block=None):
    """Pallas TPU implementation of InfoNCELoss.forward (returns scalar loss)."""
    if similarity_type not in ("cos", "dot"):
        raise Exception(
            f"Invalid similarity_type for cs loss: [current:{similarity_type}]."
            " Please choose from ['cos', 'dot']")
    if mask is not None:
        # TODO(synk): optional boolean `mask` (masked_fill on cl_logits) is unsupported.
        raise NotImplementedError("mask is not supported in the Pallas kernel")

    x1 = aug_hidden_view1
    x2 = aug_hidden_view2
    if x1.ndim > 2:
        x1 = x1.reshape(x1.shape[0], -1)
        x2 = x2.reshape(x2.shape[0], -1)
    b, d = x1.shape
    compute_dtype = jnp.dtype(compute_dtype)

    # Lane-align the feature dim (zeros change neither dots nor norms).
    d_pad = _round_up(d, 128)
    if d_pad != d:
        x1 = jnp.pad(x1, ((0, 0), (0, d_pad - d)))
        x2 = jnp.pad(x2, ((0, 0), (0, d_pad - d)))

    inv_t = jnp.float32(1.0 / float(temperature))
    x1f = x1.astype(jnp.float32)
    x2f = x2.astype(jnp.float32)
    if similarity_type == "cos":
        # No eps on purpose: zero-norm rows give NaN like the PyTorch reference.
        x1f = x1f * jax.lax.rsqrt(jnp.sum(x1f * x1f, axis=-1, keepdims=True))
        x2f = x2f * jax.lax.rsqrt(jnp.sum(x2f * x2f, axis=-1, keepdims=True))
    # Correct-class logits sim12[i, i] / t, computed once in f32 (O(B*D)).
    corr = jnp.sum(x1f * x2f, axis=-1) * inv_t

    # Query streams carry the 1/temperature scale; key streams are plain.
    q1 = (x1f * inv_t).astype(compute_dtype)
    q2 = (x2f * inv_t).astype(compute_dtype)
    k1 = x1f.astype(compute_dtype)
    k2 = x2f.astype(compute_dtype)

    # ---- generation-aware tile selection ------------------------------------
    try:
        vmem_cap = int(pltpu.get_tpu_info().vmem_capacity_bytes)
    except Exception:
        vmem_cap = 64 * 1024 * 1024  # v7x-safe fallback
    c_bytes = compute_dtype.itemsize

    def footprint(t):
        # 4 double-buffered (t, d_pad) input blocks + live (t, t) f32
        # similarity/exp tiles + (lane-padded) accumulators and output block.
        return 4 * 2 * t * d_pad * c_bytes + 6 * t * t * 4 + 8 * t * 128 * 4

    if block is None:
        block = 512 if vmem_cap > 96 * 1024 * 1024 else 256  # v5e/v6e vs v7x
        if b <= block:
            # >= 2 query blocks keeps both v7x TensorCores busy.
            block = _round_up((b + 1) // 2, 8) if b >= 16 else _round_up(b, 8)
    tile = _round_up(min(block, _round_up(b, 8)), 8)
    budget = (vmem_cap * 3) // 4
    while tile > 8 and footprint(tile) > budget:
        tile = _round_up(tile // 2, 8)

    b_pad = _round_up(b, tile)
    if b_pad != b:
        pad = ((0, b_pad - b), (0, 0))
        q1, q2, k1, k2 = (jnp.pad(a, pad) for a in (q1, q2, k1, k2))
    n_blocks = b_pad // tile

    kernel = functools.partial(_infonce_kernel, tile=tile, batch=b,
                               n_blocks=n_blocks, has_pad=(b_pad != b))
    vmem_limit = int(min(vmem_cap, max(2 * footprint(tile), 32 * 1024 * 1024)))

    per_row = pl.pallas_call(
        kernel,
        out_shape=jax.ShapeDtypeStruct((b_pad, 1), jnp.float32),
        grid_spec=pltpu.PrefetchScalarGridSpec(
            num_scalar_prefetch=0,
            grid=(n_blocks, n_blocks),
            in_specs=[
                pl.BlockSpec((tile, d_pad), lambda qi, kj: (qi, 0)),  # q1 (1/t folded)
                pl.BlockSpec((tile, d_pad), lambda qi, kj: (qi, 0)),  # q2 (1/t folded)
                pl.BlockSpec((tile, d_pad), lambda qi, kj: (kj, 0)),  # k1
                pl.BlockSpec((tile, d_pad), lambda qi, kj: (kj, 0)),  # k2
            ],
            out_specs=pl.BlockSpec((tile, 1), lambda qi, kj: (qi, 0)),
            scratch_shapes=[pltpu.VMEM((tile, 1), jnp.float32)  # m1, l1, m2, l2
                            for _ in range(4)]),
        compiler_params=pltpu.CompilerParams(
            dimension_semantics=("parallel", "arbitrary"),
            vmem_limit_bytes=vmem_limit),
    )(q1, q2, k1, k2)

    # Mean NLL over 2B rows: sum(lse1 + lse2) - 2 * sum(correct logits).
    return (jnp.sum(per_row[:b, 0]) - 2.0 * jnp.sum(corr)) / jnp.float32(2 * b)


def _reference_loss(x1, x2, temperature, similarity_type):
    """Pure-JAX mirror of the PyTorch forward, for verification."""
    if x1.ndim > 2:
        x1 = x1.reshape(x1.shape[0], -1)
        x2 = x2.reshape(x2.shape[0], -1)
    x1 = x1.astype(jnp.float32)
    x2 = x2.astype(jnp.float32)

    def cosinesim(a, b):
        h = a @ b.T
        na = jnp.sqrt(jnp.sum(a ** 2, axis=-1))[:, None]
        nb = jnp.sqrt(jnp.sum(b ** 2, axis=-1))[None, :]
        return h / (na @ nb)

    if similarity_type == "cos":
        s11, s22, s12 = cosinesim(x1, x1), cosinesim(x2, x2), cosinesim(x1, x2)
    else:
        s11, s22, s12 = x1 @ x1.T, x2 @ x2.T, x1 @ x2.T

    B = x1.shape[0]
    eye = jnp.eye(B, dtype=bool)
    s11 = jnp.where(eye, -jnp.inf, s11)
    s22 = jnp.where(eye, -jnp.inf, s22)
    logits = jnp.concatenate(
        [jnp.concatenate([s12, s11], axis=-1),
         jnp.concatenate([s22, s12.T], axis=-1)], axis=0) / temperature
    logp = jax.nn.log_softmax(logits, axis=-1)
    target = jnp.arange(2 * B)
    return -jnp.mean(logp[jnp.arange(2 * B), target])


if __name__ == "__main__":
    key = jax.random.PRNGKey(0)
    k1, k2, k3, k4 = jax.random.split(key, 4)
    temperature = 0.5
    ok = True

    # Small shapes consistent with the module: [batch, max_len, dim].
    batch, max_len, dim = 8, 4, 32  # flattened feature dim = 128
    v1 = jax.random.normal(k1, (batch, max_len, dim), dtype=jnp.float32)
    v2 = jax.random.normal(k2, (batch, max_len, dim), dtype=jnp.float32)

    # f32 compute path, both similarity types (single-tile grid).
    for sim_type in ("dot", "cos"):
        loss = jax.block_until_ready(
            infonce_loss(v1, v2, temperature=temperature,
                         similarity_type=sim_type,
                         compute_dtype=jnp.float32))
        ref = _reference_loss(v1, v2, temperature, sim_type)
        if not jnp.allclose(loss, ref, rtol=1e-4, atol=1e-4):
            ok = False
            print(f"MISMATCH (f32/{sim_type}): pallas={float(loss)} ref={float(ref)}")

    # Multi-block grid with padding (online accumulators + diag/pad lax.cond).
    w1 = jax.random.normal(k3, (40, 128), dtype=jnp.float32)
    w2 = jax.random.normal(k4, (40, 128), dtype=jnp.float32)
    for sim_type in ("dot", "cos"):
        loss = jax.block_until_ready(
            infonce_loss(w1, w2, temperature=temperature,
                         similarity_type=sim_type, block=16,
                         compute_dtype=jnp.float32))
        ref = _reference_loss(w1, w2, temperature, sim_type)
        if not jnp.allclose(loss, ref, rtol=1e-4, atol=1e-4):
            ok = False
            print(f"MISMATCH (tiled f32/{sim_type}): pallas={float(loss)} ref={float(ref)}")

    # Default bf16 MXU path (fast path on v5e/v6e/v7x), cos similarity.
    for name, (a1, a2) in (("small", (v1, v2)), ("tiled", (w1, w2))):
        loss_bf16 = jax.block_until_ready(
            infonce_loss(a1, a2, temperature=temperature, similarity_type="cos"))
        ref_cos = _reference_loss(a1, a2, temperature, "cos")
        if not jnp.allclose(loss_bf16, ref_cos, rtol=5e-2, atol=5e-2):
            ok = False
            print(f"MISMATCH (bf16/cos/{name}): pallas={float(loss_bf16)} ref={float(ref_cos)}")

    if ok:
        print("KERNEL_OK")
</pallas_src>

<mosaic_0001>
module attributes {stable_mosaic.version = 11 : i64} {
  func.func @_infonce_kernel(%arg0: i32, %arg1: i32, %arg2: memref<8x128xf32, #tpu.memory_space<vmem>>, %arg3: memref<8x128xf32, #tpu.memory_space<vmem>>, %arg4: memref<8x128xf32, #tpu.memory_space<vmem>>, %arg5: memref<8x128xf32, #tpu.memory_space<vmem>>, %arg6: memref<8x1xf32, #tpu.memory_space<vmem>>, %arg7: memref<8x1xf32, #tpu.memory_space<vmem>>, %arg8: memref<8x1xf32, #tpu.memory_space<vmem>>, %arg9: memref<8x1xf32, #tpu.memory_space<vmem>>, %arg10: memref<8x1xf32, #tpu.memory_space<vmem>>) attributes {dimension_semantics = [#tpu.dimension_semantics<parallel>, #tpu.dimension_semantics<arbitrary>], iteration_bounds = array<i64: 1, 1>, scalar_prefetch = 0 : i64, scratch_operands = 4 : i64, tpu.core_type = #tpu.core_type<tc>, window_params = [{transform_indices = @transform_0, window_bounds = array<i64: 8, 128>}, {transform_indices = @transform_1, window_bounds = array<i64: 8, 128>}, {transform_indices = @transform_2, window_bounds = array<i64: 8, 128>}, {transform_indices = @transform_3, window_bounds = array<i64: 8, 128>}, {transform_indices = @transform_4, window_bounds = array<i64: 8, 1>}]} {
    %c0_i32 = arith.constant 0 : i32
    %0 = arith.cmpi eq, %arg1, %c0_i32 : i32
    %1 = arith.extui %0 : i1 to i32
    %cst = arith.constant 0xFF800000 : f32
    %c0_i32_0 = arith.constant 0 : i32
    %2 = arith.cmpi ne, %1, %c0_i32_0 : i32
    scf.if %2 {
      %74 = vector.broadcast %cst : f32 to vector<8x1xf32>
      %c0_46 = arith.constant 0 : index
      %c0_47 = arith.constant 0 : index
      %75 = vector.load %arg7[%c0_46, %c0_47] : memref<8x1xf32, #tpu.memory_space<vmem>>, vector<8x1xf32>
      tpu.vector_store %arg7[%c0_46, %c0_47], %74 {strides = array<i32>} : memref<8x1xf32, #tpu.memory_space<vmem>>, vector<8x1xf32>,
      %76 = vector.broadcast %cst : f32 to vector<8x1xf32>
      %c0_48 = arith.constant 0 : index
      %c0_49 = arith.constant 0 : index
      %77 = vector.load %arg9[%c0_48, %c0_49] : memref<8x1xf32, #tpu.memory_space<vmem>>, vector<8x1xf32>
      tpu.vector_store %arg9[%c0_48, %c0_49], %76 {strides = array<i32>} : memref<8x1xf32, #tpu.memory_space<vmem>>, vector<8x1xf32>,
      %cst_50 = arith.constant 0.000000e+00 : f32
      %78 = vector.broadcast %cst_50 : f32 to vector<8x1xf32>
      %c0_51 = arith.constant 0 : index
      %c0_52 = arith.constant 0 : index
      %79 = vector.load %arg8[%c0_51, %c0_52] : memref<8x1xf32, #tpu.memory_space<vmem>>, vector<8x1xf32>
      tpu.vector_store %arg8[%c0_51, %c0_52], %78 {strides = array<i32>} : memref<8x1xf32, #tpu.memory_space<vmem>>, vector<8x1xf32>,
      %cst_53 = arith.constant 0.000000e+00 : f32
      %80 = vector.broadcast %cst_53 : f32 to vector<8x1xf32>
      %c0_54 = arith.constant 0 : index
      %c0_55 = arith.constant 0 : index
      %81 = vector.load %arg10[%c0_54, %c0_55] : memref<8x1xf32, #tpu.memory_space<vmem>>, vector<8x1xf32>
      tpu.vector_store %arg10[%c0_54, %c0_55], %80 {strides = array<i32>} : memref<8x1xf32, #tpu.memory_space<vmem>>, vector<8x1xf32>,
    } else {
    }
    %c0 = arith.constant 0 : index
    %c0_1 = arith.constant 0 : index
    %3 = vector.load %arg4[%c0, %c0_1] : memref<8x128xf32, #tpu.memory_space<vmem>>, vector<8x128xf32>
    %c0_2 = arith.constant 0 : index
    %c0_3 = arith.constant 0 : index
    %4 = vector.load %arg5[%c0_2, %c0_3] : memref<8x128xf32, #tpu.memory_space<vmem>>, vector<8x128xf32>
    %c0_4 = arith.constant 0 : index
    %c0_5 = arith.constant 0 : index
    %5 = vector.load %arg2[%c0_4, %c0_5] : memref<8x128xf32, #tpu.memory_space<vmem>>, vector<8x128xf32>
    %cst_6 = arith.constant dense<0.000000e+00> : vector<8x8xf32>
    %6 = tpu.matmul %5, %4, %cst_6 {dimension_numbers = #tpu.dot_dimension_numbers<[1], [1], [0], [0], [0, 0, 1, 0], [], []>} : vector<8x128xf32>, vector<8x128xf32>, vector<8x8xf32> -> vector<8x8xf32>
    %cst_7 = arith.constant dense<0.000000e+00> : vector<8x8xf32>
    %7 = tpu.matmul %5, %3, %cst_7 {dimension_numbers = #tpu.dot_dimension_numbers<[1], [1], [0], [0], [0, 0, 1, 0], [], []>} : vector<8x128xf32>, vector<8x128xf32>, vector<8x8xf32> -> vector<8x8xf32>
    %8 = arith.cmpi eq, %arg0, %arg1 : i32
    %9 = arith.extui %8 : i1 to i32
    %cst_8 = arith.constant 0xFF800000 : f32
    %c0_i32_9 = arith.constant 0 : i32
    %10 = arith.cmpi ne, %9, %c0_i32_9 : i32
    %11 = scf.if %10 -> (vector<8x8xf32>) {
      %74 = tpu.iota {dimensions = array<i32: 0>} : vector<8x8xi32>
      %75 = tpu.iota {dimensions = array<i32: 1>} : vector<8x8xi32>
      %76 = arith.cmpi eq, %74, %75 : vector<8x8xi32>
      %77 = vector.broadcast %cst_8 : f32 to vector<8x8xf32>
      %78 = arith.select %76, %77, %7 : vector<8x8xi1>, vector<8x8xf32>
      scf.yield %78 : vector<8x8xf32>
    } else {
      scf.yield %7 : vector<8x8xf32>
    }
    %cst_10 = arith.constant dense<0xFF800000> : vector<8xf32>
    %12 = vector.multi_reduction <maximumf>, %6, %cst_10 [1] : vector<8x8xf32> to vector<8xf32>
    %13 = vector.shape_cast %12 : vector<8xf32> to vector<8x1xf32>
    %cst_11 = arith.constant dense<0xFF800000> : vector<8xf32>
    %14 = vector.multi_reduction <maximumf>, %11, %cst_11 [1] : vector<8x8xf32> to vector<8xf32>
    %15 = vector.shape_cast %14 : vector<8xf32> to vector<8x1xf32>
    %16 = arith.maximumf %13, %15 : vector<8x1xf32>
    %c0_12 = arith.constant 0 : index
    %c0_13 = arith.constant 0 : index
    %17 = vector.load %arg7[%c0_12, %c0_13] : memref<8x1xf32, #tpu.memory_space<vmem>>, vector<8x1xf32>
    %18 = arith.maximumf %17, %16 : vector<8x1xf32>
    %c0_14 = arith.constant 0 : index
    %c0_15 = arith.constant 0 : index
    %19 = vector.load %arg7[%c0_14, %c0_15] : memref<8x1xf32, #tpu.memory_space<vmem>>, vector<8x1xf32>
    %20 = arith.subf %19, %18 : vector<8x1xf32>
    %21 = math.exp %20 : vector<8x1xf32>
    %c0_16 = arith.constant 0 : index
    %c0_17 = arith.constant 0 : index
    %22 = vector.load %arg8[%c0_16, %c0_17] : memref<8x1xf32, #tpu.memory_space<vmem>>, vector<8x1xf32>
    %23 = arith.mulf %21, %22 : vector<8x1xf32>
    %24 = vector.broadcast %18 : vector<8x1xf32> to vector<8x8xf32>
    %25 = arith.subf %6, %24 : vector<8x8xf32>
    %26 = math.exp %25 : vector<8x8xf32>
    %cst_18 = arith.constant dense<0.000000e+00> : vector<8xf32>
    %27 = vector.multi_reduction <add>, %26, %cst_18 [1] : vector<8x8xf32> to vector<8xf32>
    %28 = vector.shape_cast %27 : vector<8xf32> to vector<8x1xf32>
    %29 = arith.addf %23, %28 : vector<8x1xf32>
    %30 = vector.broadcast %18 : vector<8x1xf32> to vector<8x8xf32>
    %31 = arith.subf %11, %30 : vector<8x8xf32>
    %32 = math.exp %31 : vector<8x8xf32>
    %cst_19 = arith.constant dense<0.000000e+00> : vector<8xf32>
    %33 = vector.multi_reduction <add>, %32, %cst_19 [1] : vector<8x8xf32> to vector<8xf32>
    %34 = vector.shape_cast %33 : vector<8xf32> to vector<8x1xf32>
    %35 = arith.addf %29, %34 : vector<8x1xf32>
    %c0_20 = arith.constant 0 : index
    %c0_21 = arith.constant 0 : index
    %36 = vector.load %arg8[%c0_20, %c0_21] : memref<8x1xf32, #tpu.memory_space<vmem>>, vector<8x1xf32>
    tpu.vector_store %arg8[%c0_20, %c0_21], %35 {strides = array<i32>} : memref<8x1xf32, #tpu.memory_space<vmem>>, vector<8x1xf32>,
    %c0_22 = arith.constant 0 : index
    %c0_23 = arith.constant 0 : index
    %37 = vector.load %arg7[%c0_22, %c0_23] : memref<8x1xf32, #tpu.memory_space<vmem>>, vector<8x1xf32>
    tpu.vector_store %arg7[%c0_22, %c0_23], %18 {strides = array<i32>} : memref<8x1xf32, #tpu.memory_space<vmem>>, vector<8x1xf32>,
    %c0_24 = arith.constant 0 : index
    %c0_25 = arith.constant 0 : index
    %38 = vector.load %arg3[%c0_24, %c0_25] : memref<8x128xf32, #tpu.memory_space<vmem>>, vector<8x128xf32>
    %cst_26 = arith.constant dense<0.000000e+00> : vector<8x8xf32>
    %39 = tpu.matmul %38, %4, %cst_26 {dimension_numbers = #tpu.dot_dimension_numbers<[1], [1], [0], [0], [0, 0, 1, 0], [], []>} : vector<8x128xf32>, vector<8x128xf32>, vector<8x8xf32> -> vector<8x8xf32>
    %cst_27 = arith.constant dense<0.000000e+00> : vector<8x8xf32>
    %40 = tpu.matmul %38, %3, %cst_27 {dimension_numbers = #tpu.dot_dimension_numbers<[1], [1], [0], [0], [0, 0, 1, 0], [], []>} : vector<8x128xf32>, vector<8x128xf32>, vector<8x8xf32> -> vector<8x8xf32>
    %41 = arith.cmpi eq, %arg0, %arg1 : i32
    %42 = arith.extui %41 : i1 to i32
    %cst_28 = arith.constant 0xFF800000 : f32
    %c0_i32_29 = arith.constant 0 : i32
    %43 = arith.cmpi ne, %42, %c0_i32_29 : i32
    %44 = scf.if %43 -> (vector<8x8xf32>) {
      %74 = tpu.iota {dimensions = array<i32: 0>} : vector<8x8xi32>
      %75 = tpu.iota {dimensions = array<i32: 1>} : vector<8x8xi32>
      %76 = arith.cmpi eq, %74, %75 : vector<8x8xi32>
      %77 = vector.broadcast %cst_28 : f32 to vector<8x8xf32>
      %78 = arith.select %76, %77, %39 : vector<8x8xi1>, vector<8x8xf32>
      scf.yield %78 : vector<8x8xf32>
    } else {
      scf.yield %39 : vector<8x8xf32>
    }
    %cst_30 = arith.constant dense<0xFF800000> : vector<8xf32>
    %45 = vector.multi_reduction <maximumf>, %44, %cst_30 [1] : vector<8x8xf32> to vector<8xf32>
    %46 = vector.shape_cast %45 : vector<8xf32> to vector<8x1xf32>
    %cst_31 = arith.constant dense<0xFF800000> : vector<8xf32>
    %47 = vector.multi_reduction <maximumf>, %40, %cst_31 [1] : vector<8x8xf32> to vector<8xf32>
    %48 = vector.shape_cast %47 : vector<8xf32> to vector<8x1xf32>
    %49 = arith.maximumf %46, %48 : vector<8x1xf32>
    %c0_32 = arith.constant 0 : index
    %c0_33 = arith.constant 0 : index
    %50 = vector.load %arg9[%c0_32, %c0_33] : memref<8x1xf32, #tpu.memory_space<vmem>>, vector<8x1xf32>
    %51 = arith.maximumf %50, %49 : vector<8x1xf32>
    %c0_34 = arith.constant 0 : index
    %c0_35 = arith.constant 0 : index
    %52 = vector.load %arg9[%c0_34, %c0_35] : memref<8x1xf32, #tpu.memory_space<vmem>>, vector<8x1xf32>
    %53 = arith.subf %52, %51 : vector<8x1xf32>
    %54 = math.exp %53 : vector<8x1xf32>
    %c0_36 = arith.constant 0 : index
    %c0_37 = arith.constant 0 : index
    %55 = vector.load %arg10[%c0_36, %c0_37] : memref<8x1xf32, #tpu.memory_space<vmem>>, vector<8x1xf32>
    %56 = arith.mulf %54, %55 : vector<8x1xf32>
    %57 = vector.broadcast %51 : vector<8x1xf32> to vector<8x8xf32>
    %58 = arith.subf %44, %57 : vector<8x8xf32>
    %59 = math.exp %58 : vector<8x8xf32>
    %cst_38 = arith.constant dense<0.000000e+00> : vector<8xf32>
    %60 = vector.multi_reduction <add>, %59, %cst_38 [1] : vector<8x8xf32> to vector<8xf32>
    %61 = vector.shape_cast %60 : vector<8xf32> to vector<8x1xf32>
    %62 = arith.addf %56, %61 : vector<8x1xf32>
    %63 = vector.broadcast %51 : vector<8x1xf32> to vector<8x8xf32>
    %64 = arith.subf %40, %63 : vector<8x8xf32>
    %65 = math.exp %64 : vector<8x8xf32>
    %cst_39 = arith.constant dense<0.000000e+00> : vector<8xf32>
    %66 = vector.multi_reduction <add>, %65, %cst_39 [1] : vector<8x8xf32> to vector<8xf32>
    %67 = vector.shape_cast %66 : vector<8xf32> to vector<8x1xf32>
    %68 = arith.addf %62, %67 : vector<8x1xf32>
    %c0_40 = arith.constant 0 : index
    %c0_41 = arith.constant 0 : index
    %69 = vector.load %arg10[%c0_40, %c0_41] : memref<8x1xf32, #tpu.memory_space<vmem>>, vector<8x1xf32>
    tpu.vector_store %arg10[%c0_40, %c0_41], %68 {strides = array<i32>} : memref<8x1xf32, #tpu.memory_space<vmem>>, vector<8x1xf32>,
    %c0_42 = arith.constant 0 : index
    %c0_43 = arith.constant 0 : index
    %70 = vector.load %arg9[%c0_42, %c0_43] : memref<8x1xf32, #tpu.memory_space<vmem>>, vector<8x1xf32>
    tpu.vector_store %arg9[%c0_42, %c0_43], %51 {strides = array<i32>} : memref<8x1xf32, #tpu.memory_space<vmem>>, vector<8x1xf32>,
    %c0_i32_44 = arith.constant 0 : i32
    %71 = arith.cmpi eq, %arg1, %c0_i32_44 : i32
    %72 = arith.extui %71 : i1 to i32
    %c0_i32_45 = arith.constant 0 : i32
    %73 = arith.cmpi ne, %72, %c0_i32_45 : i32
    scf.if %73 {
      %c0_46 = arith.constant 0 : index
      %c0_47 = arith.constant 0 : index
      %74 = vector.load %arg7[%c0_46, %c0_47] : memref<8x1xf32, #tpu.memory_space<vmem>>, vector<8x1xf32>
      %c0_48 = arith.constant 0 : index
      %c0_49 = arith.constant 0 : index
      %75 = vector.load %arg8[%c0_48, %c0_49] : memref<8x1xf32, #tpu.memory_space<vmem>>, vector<8x1xf32>
      %76 = math.log %75 : vector<8x1xf32>
      %77 = arith.addf %74, %76 : vector<8x1xf32>
      %c0_50 = arith.constant 0 : index
      %c0_51 = arith.constant 0 : index
      %78 = vector.load %arg9[%c0_50, %c0_51] : memref<8x1xf32, #tpu.memory_space<vmem>>, vector<8x1xf32>
      %79 = arith.addf %77, %78 : vector<8x1xf32>
      %c0_52 = arith.constant 0 : index
      %c0_53 = arith.constant 0 : index
      %80 = vector.load %arg10[%c0_52, %c0_53] : memref<8x1xf32, #tpu.memory_space<vmem>>, vector<8x1xf32>
      %81 = math.log %80 : vector<8x1xf32>
      %82 = arith.addf %79, %81 : vector<8x1xf32>
      %c0_54 = arith.constant 0 : index
      %c0_55 = arith.constant 0 : index
      %83 = vector.load %arg6[%c0_54, %c0_55] : memref<8x1xf32, #tpu.memory_space<vmem>>, vector<8x1xf32>
      tpu.vector_store %arg6[%c0_54, %c0_55], %82 {strides = array<i32>} : memref<8x1xf32, #tpu.memory_space<vmem>>, vector<8x1xf32>,
    } else {
    }
    return
  }
  func.func @transform_0(%arg0: i32, %arg1: i32) -> (i32, i32) {
    %c0_i32 = arith.constant 0 : i32
    %c0_i32_0 = arith.constant 0 : i32
    return %arg0, %c0_i32 : i32, i32
  }
  func.func @transform_1(%arg0: i32, %arg1: i32) -> (i32, i32) {
    %c0_i32 = arith.constant 0 : i32
    %c0_i32_0 = arith.constant 0 : i32
    return %arg0, %c0_i32 : i32, i32
  }
  func.func @transform_2(%arg0: i32, %arg1: i32) -> (i32, i32) {
    %c0_i32 = arith.constant 0 : i32
    %c0_i32_0 = arith.constant 0 : i32
    return %arg1, %c0_i32 : i32, i32
  }
  func.func @transform_3(%arg0: i32, %arg1: i32) -> (i32, i32) {
    %c0_i32 = arith.constant 0 : i32
    %c0_i32_0 = arith.constant 0 : i32
    return %arg1, %c0_i32 : i32, i32
  }
  func.func @transform_4(%arg0: i32, %arg1: i32) -> (i32, i32) {
    %c0_i32 = arith.constant 0 : i32
    %c0_i32_0 = arith.constant 0 : i32
    return %arg0, %c0_i32 : i32, i32
  }
}

</mosaic_0001>

<bundles_post_ra>
// kernel: tpu_custom_call.1
= control target key start
LH: loop header
LB: loop body
LE: loop exit
PB: predicated region body
PF: predicated region fallthrough
CT: control target
= control target key end

     0   :  { %9 = vsyncpa [#allocation7], 0  ;;  %s689_s0 = inlined_call_operand.hbm [shape: f32[8,128], index: 0, kind: input, shape index: {}]   ;;  %s690_s1 = inlined_call_operand.hbm [shape: f32[8,128], index: 1, kind: input, shape index: {}]   ;;  %s691_s2 = inlined_call_operand.hbm [shape: f32[8,128], index: 2, kind: input, shape index: {}]   ;;  %s692_s3 = inlined_call_operand.hbm [shape: f32[8,128], index: 3, kind: input, shape index: {}]   ;;  %s693_s4 = inlined_call_operand.vmem [shape: f32[8,1], index: 4, kind: output, shape index: {}]  }
   0x1   :  { %10 = vsyncpa [#allocation9], 0 }
   0x2   :  { %11 = vsyncpa [#allocation12], 0  ;;  %s620_s15 = smov [#allocation8]   ;;  %s621_s17 = smov [#allocation6]  }
   0x3   :  { %s28_s16 = sshll.u32 %s620_s15, 4  ;;  %s18_s18 = sshll.u32 %s621_s17, 4  ;;  %s29_s16 = int_to_ptr.vmem [resolvable:$true] %s28_s16  ;;  %s19_s18 = int_to_ptr.vmem [resolvable:$true] %s18_s18 }
   0x4   :  { %s542_s19 = scalar_lea.vmem %s29_s16, 128  ;;  %p547_p1 = scmp.lt.s32.totalorder %s29_s16, %s29_s16 }
   0x5   :  { %p543_p0 = scmp.ne.s32.totalorder %s29_s16, %s542_s19  ;;  %p548_p2 = scmp.lt.s32.totalorder %s542_s19, %s542_s19 }
   0x7   :  { %p549_p3 = por %p548_p2, %p547_p1 }
   0x9   :  { %p550_p4 = pnand %p549_p3, %p543_p0 }
   0xb   :  { %553 = shalt.err (!%p550_p4)
}
   0xc   :  { %31 = dma.hbm_to_vmem [thread:$0]  %s690_s1, 128, %s29_s16, [#allocation9]  }
   0xd   :  { %s562_s22 = scalar_lea.vmem %s19_s18, 128  ;;  %p567_p6 = scmp.lt.s32.totalorder %s19_s18, %s19_s18 }
   0xe   :  { %p563_p5 = scmp.ne.s32.totalorder %s19_s18, %s562_s22  ;;  %p568_p7 = scmp.lt.s32.totalorder %s562_s22, %s562_s22 }
  0x10   :  { %p569_p8 = por %p568_p7, %p567_p6 }
  0x12   :  { %p570_p9 = pnand %p569_p8, %p563_p5 }
  0x14   :  { %573 = shalt.err (!%p570_p9)
}
  0x15   :  { %21 = dma.hbm_to_vmem [thread:$0]  %s689_s0, 128, %s19_s18, [#allocation7]  }
  0x16   :  { %s622_s25 = smov [#allocation10]   ;;  %s623_s27 = smov [#allocation11]  }
  0x17   :  { %s38_s26 = sshll.u32 %s622_s25, 4  ;;  %s48_s28 = sshll.u32 %s623_s27, 4  ;;  %s39_s26 = int_to_ptr.vmem [resolvable:$true] %s38_s26  ;;  %s49_s28 = int_to_ptr.vmem [resolvable:$true] %s48_s28 }
  0x18   :  { %s582_s29 = scalar_lea.vmem %s39_s26, 128  ;;  %p587_p11 = scmp.lt.s32.totalorder %s39_s26, %s39_s26 }
  0x19   :  { %p583_p10 = scmp.ne.s32.totalorder %s39_s26, %s582_s29  ;;  %p588_p12 = scmp.lt.s32.totalorder %s582_s29, %s582_s29 }
  0x1b   :  { %p589_p13 = por %p588_p12, %p587_p11 }
  0x1d   :  { %p590_p0 = pnand %p589_p13, %p583_p10 }
  0x1f   :  { %593 = shalt.err (!%p590_p0)
}
  0x20   :  { %41 = dma.hbm_to_vmem [thread:$0]  %s691_s2, 128, %s39_s26, [#allocation9]  }
  0x21   :  { %s602_s5 = scalar_lea.vmem %s49_s28, 128  ;;  %p607_p2 = scmp.lt.s32.totalorder %s49_s28, %s49_s28 }
  0x22   :  { %p603_p1 = scmp.ne.s32.totalorder %s49_s28, %s602_s5  ;;  %p608_p3 = scmp.lt.s32.totalorder %s602_s5, %s602_s5 }
  0x24   :  { %p609_p4 = por %p608_p3, %p607_p2 }
  0x26   :  { %p610_p5 = pnand %p609_p4, %p603_p1 }
  0x28   :  { %613 = shalt.err (!%p610_p5)
}
  0x29   :  { %51 = dma.hbm_to_vmem [thread:$0]  %s692_s3, 128, %s49_s28, [#allocation12]  }
  0x2a   :  { %614 = dma.done.wait [#allocation7], 128  }
  0x2b   :  { %615 = vsyncadd [#allocation7], 4294967168 }
  0x2c   :  { %616 = dma.done.wait [#allocation9], 256  }
  0x2d   :  { %617 = vsyncadd [#allocation9], 4294967040 }
  0x2e   :  { %618 = dma.done.wait [#allocation12], 128  }
  0x2f   :  { %619 = vsyncadd [#allocation12], 4294967168  ;;  %v624_v0 = vmov 0.0   ;;  %vm625_vm0 = vmmov 0   ;;  %v74_v1 = vld [vmem:[#allocation11] sm:$0xff]  ;;  %v73_v2 = vld [vmem:[#allocation10] sm:$0xff]  ;;  %v220_v5 = vlaneseq }
  0x30   :  { %488 = vmatprep.subr.mxu0 %v624_v0  ;;  %490 = vmatprep.mubr.msk.f32.mxu0 %vm625_vm0, %v624_v0  ;;  %v75_v3 = vld [vmem:[#allocation6] sm:$0xff]  ;;  %v268_v4 = vld [vmem:[#allocation8] sm:$0xff]  ;;  %vm231_vm1 = vcmask 64512   ;;  %vm68_vm3 = vcmask 7168   ;;  %v626_v22 = vmov -inf   ;;  %v627_v23 = vmov 0  }
  0x31   :  { %493 = vmatprep.subr.mxu1 %v624_v0  ;;  %495 = vmatprep.mubr.msk.f32.mxu1 %vm625_vm0, %v624_v0  ;;  %v221_v6 = vshrl.u32 %v220_v5, 7  ;;  %v223_v7 = vand.u32 127, %v220_v5  ;;  %69 = vst.msk [vmem:[#allocation2] sm:$0xff] %vm68_vm3, %v626_v22  ;;  %70 = vst.msk [vmem:[#allocation4] sm:$0xff] %vm68_vm3, %v626_v22 }
  0x32   :  { %489 = vmatpush3.xpose.msra.mxu0 %v74_v1  ;;  %494 = vmatpush3.xpose.msra.mxu1 %v73_v2  ;;  %71 = vst.msk [vmem:[#allocation3] sm:$0xff] %vm68_vm3, %v624_v0  ;;  %72 = vst.msk [vmem:[#allocation5] sm:$0xff] %vm68_vm3, %v624_v0 }
  0x33   :  { %498 = vmatprep.subr.mxu0 %v624_v0  ;;  %503 = vmatprep.subr.mxu1 %v624_v0  ;;  %vm224_vm2 = vcmp.eq.s32.totalorder %v221_v6, %v223_v7 }
  0x34   :  { %516 = vset.pattern.permute.xlu0 %v627_v23  ;;  %517 = vset.pattern.permute.xlu1 %v627_v23 }
  0x35   :  { %491 = vmatmul.mubr.f32.vlgmr.msra.gmra.mxu0 %v75_v3  ;;  %496 = vmatmul.mubr.f32.vlgmr.msra.gmra.mxu1 %v75_v3 }
  0x36   :  { %499 = vmatpush3.xpose.msra.mxu0 %v74_v1  ;;  %500 = vmatprep.mubr.msk.f32.mxu0 %vm625_vm0, %v624_v0 }
  0x37   :  { %504 = vmatpush3.xpose.msra.mxu1 %v73_v2  ;;  %505 = vmatprep.mubr.msk.f32.mxu1 %vm625_vm0, %v624_v0 }
  0x38   :  { %v239_v26 = vld [vmem:[#allocation2] sm:$0xff]  ;;  %v430_v32 = vld [vmem:[#allocation4] sm:$0xff] }
  0x39   :  { %501 = vmatmul.mubr.f32.vlgmr.msra.gmra.mxu0 %v268_v4  ;;  %v244_v57 = vld [vmem:[#allocation3] sm:$0xff]  ;;  %v435_v0 = vld [vmem:[#allocation5] sm:$0xff] }
  0x3a   :  { %506 = vmatmul.mubr.f32.vlgmr.msra.gmra.mxu1 %v268_v4 }
  0xf5   :  { %v142_v8 = vpop.f32.mrf.mxu0  ;;  %v212_v9 = vpop.f32.mrf.mxu1 }
  0xf6   :  { %v232_v10 = vsel %vm231_vm1, %v142_v8, -inf  ;;  %v225_v11 = vsel %vm224_vm2, -inf, %v212_v9 }
  0xf7   :  { %233 = vmax.xlane.f32.xlu0 %v232_v10  ;;  %v492_v12 = vpop.f32.mrf.mxu0  ;;  %v497_v13 = vpop.f32.mrf.mxu1  ;;  %v235_v14 = vsel %vm231_vm1, %v225_v11, -inf }
  0xf9   :  { %v335_v15 = vpop.f32.mrf.mxu0 }
  0xfa   :  { %v417_v16 = vsel %vm224_vm2, -inf, %v335_v15  ;;  %v405_v17 = vpop.f32.mrf.mxu1 }
  0xfb   :  { %v502_v18 = vpop.f32.mrf.mxu0  ;;  %236 = vmax.xlane.f32.xlu0 %v235_v14  ;;  %v423_v19 = vsel %vm231_vm1, %v417_v16, -inf  ;;  %v426_v21 = vsel %vm231_vm1, %v405_v17, -inf }
  0xfc   :  { %424 = vmax.xlane.f32.xlu1 %v423_v19  ;;  %v507_v20 = vpop.f32.mrf.mxu1 }
 0x100   :  { %427 = vmax.xlane.f32.xlu1 %v426_v21 }
 0x180   :  { %v234_v24 = vpop.xlane.xlu0 %233 }
 0x184   :  { %v237_v25 = vpop.xlane.xlu0 %236 }
 0x185   :  { %v238_v27 = vmax.f32 %v234_v24, %v237_v25  ;;  %v425_v28 = vpop.xlane.xlu1 %424 }
 0x187   :  { %v240_v29 = vmax.f32 %v239_v26, %v238_v27 }
 0x189   :  { %v241_v30 = vsub.f32 %v239_v26, %v240_v29  ;;  %267 = vst.msk [vmem:[#allocation2] sm:$0xff] %vm68_vm3, %v240_v29  ;;  %v428_v31 = vpop.xlane.xlu1 %427  ;;  %248 = vperm.xlu0 %516, %v240_v29  }
 0x18a   :  { %v429_v33 = vmax.f32 %v425_v28, %v428_v31 }
 0x18b   :  { %v242_v54 = vmul.f32 1.442695, %v241_v30 }
 0x18c   :  { %v431_v34 = vmax.f32 %v430_v32, %v429_v33 }
 0x18e   :  { %v432_v35 = vsub.f32 %v430_v32, %v431_v34  ;;  %457 = vst.msk [vmem:[#allocation4] sm:$0xff] %vm68_vm3, %v431_v34  ;;  %439 = vperm.xlu1 %517, %v431_v34  }
 0x190   :  { %v433_v55 = vmul.f32 1.442695, %v432_v35  ;;  %v461_v10 = vld [vmem:[#allocation2] sm:$0xff] }
 0x195   :  { %v466_v13 = vld [vmem:[#allocation4] sm:$0xff] }
 0x204   :  { %v249_v36 = vpop.permute.xlu0 %248 }
 0x205   :  { %v251_v37 = vsub.f32 %v142_v8, %v249_v36  ;;  %v258_v38 = vsub.f32 %v225_v11, %v249_v36 }
 0x207   :  { %v252_v39 = vmul.f32 1.442695, %v251_v37  ;;  %v259_v40 = vmul.f32 1.442695, %v258_v38 }
 0x209   :  { %518 = vpow2.f32 %v252_v39  ;;  %v440_v41 = vpop.permute.xlu1 %439 }
 0x20a   :  { %520 = vpow2.f32 %v259_v40  ;;  %v442_v42 = vsub.f32 %v417_v16, %v440_v41  ;;  %v449_v43 = vsub.f32 %v405_v17, %v440_v41 }
 0x20c   :  { %v443_v44 = vmul.f32 1.442695, %v442_v42  ;;  %v450_v45 = vmul.f32 1.442695, %v449_v43 }
 0x20e   :  { %522 = vpow2.f32 %v443_v44 }
 0x20f   :  { %524 = vpow2.f32 %v450_v45 }
 0x210   :  { %526 = vpow2.f32 %v242_v54 }
 0x211   :  { %528 = vpow2.f32 %v433_v55 }
 0x216   :  { %v519_v46 = vpop.eup %518 }
 0x217   :  { %v521_v47 = vpop.eup %520  ;;  %v254_v48 = vsel %vm231_vm1, %v519_v46, 0.0 }
 0x218   :  { %v261_v49 = vsel %vm231_vm1, %v521_v47, 0.0  ;;  %255 = vadd.xlane.f32.xlu1 %v254_v48 }
 0x219   :  { %262 = vadd.xlane.f32.xlu0 %v261_v49 }
 0x21b   :  { %v523_v50 = vpop.eup %522 }
 0x21c   :  { %v445_v51 = vsel %vm231_vm1, %v523_v50, 0.0  ;;  %v525_v52 = vpop.eup %524 }
 0x21d   :  { %446 = vadd.xlane.f32.xlu1 %v445_v51  ;;  %v452_v53 = vsel %vm231_vm1, %v525_v52, 0.0  ;;  %v527_v56 = vpop.eup %526 }
 0x21e   :  { %v245_v58 = vmul.f32 %v527_v56, %v244_v57  ;;  %v529_v62 = vpop.eup %528 }
 0x21f   :  { %v436_v2 = vmul.f32 %v529_v62, %v435_v0 }
 0x221   :  { %453 = vadd.xlane.f32.xlu1 %v452_v53 }
 0x2a1   :  { %v256_v59 = vpop.xlane.xlu1 %255 }
 0x2a2   :  { %v257_v60 = vadd.f32 %v256_v59, %v245_v58  ;;  %v263_v61 = vpop.xlane.xlu0 %262 }
 0x2a4   :  { %v264_v63 = vadd.f32 %v263_v61, %v257_v60 }
 0x2a6   :  { %266 = vst.msk [vmem:[#allocation3] sm:$0xff] %vm68_vm3, %v264_v63  ;;  %v447_v1 = vpop.xlane.xlu1 %446 }
 0x2a7   :  { %v448_v3 = vadd.f32 %v447_v1, %v436_v2 }
 0x2aa   :  { %v454_v4 = vpop.xlane.xlu1 %453 }
 0x2ab   :  { %v455_v5 = vadd.f32 %v454_v4, %v448_v3 }
 0x2ad   :  { %v462_v6 = vld [vmem:[#allocation3] sm:$0xff]  ;;  %456 = vst.msk [vmem:[#allocation5] sm:$0xff] %vm68_vm3, %v455_v5 }
 0x2ae   :  { %530 = vlog2.f32 %v462_v6 }
 0x2b4   :  { %v468_v7 = vld [vmem:[#allocation5] sm:$0xff] }
 0x2b5   :  { %532 = vlog2.f32 %v468_v7 }
 0x2bb   :  { %v531_v8 = vpop.eup %530 }
 0x2bc   :  { %v464_v9 = vmul.f32 0.6931472, %v531_v8 }
 0x2be   :  { %v465_v11 = vadd.f32 %v464_v9, %v461_v10 }
 0x2c0   :  { %v467_v14 = vadd.f32 %v466_v13, %v465_v11 }
 0x2c2   :  { %v533_v12 = vpop.eup %532 }
 0x2c3   :  { %v470_v15 = vmul.f32 0.6931472, %v533_v12 }
 0x2c5   :  { %v471_v16 = vadd.f32 %v470_v15, %v467_v14 }
 0x2c7   :  { %472 = vst.msk [vmem:[%s693_s4] sm:$0xff] %vm68_vm3, %v471_v16 }
 0x2c8   :  { %477 = vsyncpa [#allocation7], 1 }
 0x2c9   :  { %478 = vsyncpa [#allocation9], 1 }
 0x2ca   :  { %479 = vsyncpa [#allocation12], 1 }

</bundles_post_ra>
